<compile_context>
chip_gen: v7x
topology: tpu7x:2x2x1
jax: 0.10.0
libtpu: 0.0.40
codegen_flags: <defaults>
</compile_context>

<pallas_src>
import functools
import math

import jax
import jax.numpy as jnp
from jax.experimental import pallas as pl
from jax.experimental.pallas import tpu as pltpu


def _sce_tile_kernel(pred_ref, labels_ref, out_ref, *, alpha, beta, n_rows, tile_n):
    """Per-tile partial sum of alpha*CE + beta*RCE, written to out_ref (1,1,1)."""
    i = pl.program_id(0)
    logits = pred_ref[...].astype(jnp.float32)               # (T, C)
    labels = labels_ref[...]                                   # (T, 1) int32

    # --- shared softmax statistics ---
    m = jnp.max(logits, axis=-1, keepdims=True)                # (T, 1)  XLU
    e = jnp.exp(logits - m)                                     # (T, C)  EUP
    sum_e = jnp.sum(e, axis=-1, keepdims=True)                  # (T, 1)  XLU
    inv_sum = pl.reciprocal(sum_e, approx=False)                # exact, per row

    # logit at the label column via iota+compare (no gather)
    cls = jax.lax.broadcasted_iota(jnp.int32, logits.shape, 1)
    logit_y = jnp.sum(jnp.where(cls == labels, logits, 0.0),
                      axis=-1, keepdims=True)                   # (T, 1)

    # --- cross entropy: logsumexp - logit_y ---
    ce_row = (m + jnp.log(sum_e)) - logit_y                     # (T, 1)

    # --- reverse cross entropy with clamped one-hot ---
    #   rce = -log(1e-4) * (sum_c clamp(p_c) - clamp(p_y)),  clamp = max(., 1e-7)
    #   sum_c max(p_c, 1e-7) = inv_sum * sum_c max(e_c, 1e-7 * sum_e)
    p_sum = inv_sum * jnp.sum(jnp.maximum(e, 1e-7 * sum_e),
                              axis=-1, keepdims=True)           # (T, 1)
    p_y = jnp.maximum(jnp.exp(logit_y - m) * inv_sum, 1e-7)     # (T, 1) per-row only
    rce_row = (-math.log(1e-4)) * (p_sum - p_y)                 # (T, 1)

    loss_row = jnp.float32(alpha) * ce_row + jnp.float32(beta) * rce_row

    # mask rows past the true batch size (ragged last tile; n_rows is static)
    row = i * tile_n + jax.lax.broadcasted_iota(jnp.int32, loss_row.shape, 0)
    loss_row = jnp.where(row < n_rows, loss_row, 0.0)

    tile_sum = jnp.sum(loss_row, axis=0, keepdims=True)         # (1, 1)
    out_ref[...] = tile_sum.reshape(1, 1, 1)


def _round_up(x, m):
    return ((x + m - 1) // m) * m


def _vmem_limit_bytes():
    """Generation-aware VMEM limit: ~half of physical, clamped to [32, 96] MiB."""
    phys = 64 * 1024 * 1024                    # conservative fallback (v7x per-TC)
    try:
        info = pltpu.get_tpu_info()
        phys = int(getattr(info, "vmem_capacity_bytes", phys))
    except Exception:
        pass
    return int(min(96 << 20, max(32 << 20, phys // 2)))


def _choose_tile_n(n, c, itemsize, vmem_limit):
    """Largest multiple-of-8 row tile such that 2 pipeline buffers + ~3 f32
    full-width temporaries fit in half the VMEM limit; small batches are split
    into >=2 (up to 4) tiles so both TensorCores of 2-TC parts (v7x) get work."""
    lane_c = _round_up(max(c, 1), 128)                      # lane-padded class axis
    per_row = 2 * lane_c * itemsize + 3 * lane_c * 4        # 2 in-bufs + ~3 f32 temps
    cap = max(8, (vmem_limit // 2) // per_row)
    max_tile = 8192 if c < 512 else 2048
    tile = max(8, (min(int(max_tile), int(cap)) // 8) * 8)
    if n <= tile:
        target_tiles = min(4, max(1, -(-n // 8)))           # >=2 tiles when possible
        tile = _round_up(-(-n // target_tiles), 8)
    return tile


def sce_loss(pred, labels, *, num_classes, alpha=1.0, beta=1.0, tile_n=None):
    """pred: (N, C) float logits, labels: (N,) int -> scalar float32 SCE loss."""
    N, C = pred.shape
    assert C == num_classes

    labels2d = labels.astype(jnp.int32).reshape(N, 1)
    vmem_limit = _vmem_limit_bytes()

    if tile_n is None:
        tile_n = _choose_tile_n(N, C, jnp.dtype(pred.dtype).itemsize, vmem_limit)
    else:
        tile_n = max(8, _round_up(int(tile_n), 8))          # respect (8,128) sublane rule
        tile_n = min(tile_n, _round_up(N, 8))

    n_tiles = pl.cdiv(N, tile_n)

    kernel = functools.partial(
        _sce_tile_kernel, alpha=float(alpha), beta=float(beta),
        n_rows=N, tile_n=tile_n)

    partials = pl.pallas_call(
        kernel,
        out_shape=jax.ShapeDtypeStruct((n_tiles, 1, 1), jnp.float32),
        grid_spec=pltpu.PrefetchScalarGridSpec(
            num_scalar_prefetch=0,
            grid=(n_tiles,),
            in_specs=[
                pl.BlockSpec((tile_n, C), lambda i: (i, 0)),
                pl.BlockSpec((tile_n, 1), lambda i: (i, 0)),
            ],
            out_specs=pl.BlockSpec((1, 1, 1), lambda i: (i, 0, 0)),
        ),
        compiler_params=pltpu.CompilerParams(
            dimension_semantics=("parallel",),   # independent tiles -> megacore on v7x
            vmem_limit_bytes=vmem_limit,
        ),
    )(pred, labels2d)

    # final mean in the wrapper: one tiny XLA reduce over n_tiles partial sums
    return jnp.sum(partials) / jnp.float32(N)


def sce_reference(pred, labels, *, num_classes, alpha=1.0, beta=1.0):
    logits = pred.astype(jnp.float32)
    logp = jax.nn.log_softmax(logits, axis=1)
    ce = -jnp.mean(jnp.take_along_axis(logp, labels[:, None].astype(jnp.int32), axis=1))
    probs = jnp.clip(jax.nn.softmax(logits, axis=1), 1e-7, 1.0)
    onehot = jnp.clip(jax.nn.one_hot(labels, num_classes, dtype=jnp.float32), 1e-4, 1.0)
    rce = -jnp.sum(probs * jnp.log(onehot), axis=1)
    return alpha * ce + beta * jnp.mean(rce)


if __name__ == "__main__":
    key = jax.random.PRNGKey(0)
    k1, k2, k3, k4 = jax.random.split(key, 4)

    # Case 1: small batch, auto tile chooser (splits into 2 parallel tiles).
    N, C = 16, 32
    alpha, beta = 1.0, 1.0
    pred = jax.random.normal(k1, (N, C), dtype=jnp.float32)
    labels = jax.random.randint(k2, (N,), 0, C, dtype=jnp.int32)

    loss = jax.block_until_ready(
        sce_loss(pred, labels, num_classes=C, alpha=alpha, beta=beta)
    )
    ref = sce_reference(pred, labels, num_classes=C, alpha=alpha, beta=beta)
    assert jnp.allclose(loss, ref, atol=1e-5, rtol=1e-5), (loss, ref)

    # Case 2: ragged batch (exercises the in-kernel row mask, no wrapper pad).
    N2 = 20
    pred2 = jax.random.normal(k3, (N2, C), dtype=jnp.float32)
    labels2 = jax.random.randint(k4, (N2,), 0, C, dtype=jnp.int32)

    loss2 = jax.block_until_ready(
        sce_loss(pred2, labels2, num_classes=C, alpha=0.5, beta=2.0, tile_n=8)
    )
    ref2 = sce_reference(pred2, labels2, num_classes=C, alpha=0.5, beta=2.0)
    assert jnp.allclose(loss2, ref2, atol=1e-5, rtol=1e-5), (loss2, ref2)

    print("KERNEL_OK")
</pallas_src>

<mosaic_0001>
module attributes {stable_mosaic.version = 11 : i64} {
  func.func @_sce_tile_kernel(%arg0: i32, %arg1: memref<8x32xf32, #tpu.memory_space<vmem>>, %arg2: memref<8x1xi32, #tpu.memory_space<vmem>>, %arg3: memref<1x1x1xf32, #tpu.memory_space<vmem>>) attributes {dimension_semantics = [#tpu.dimension_semantics<parallel>], iteration_bounds = array<i64: 2>, scalar_prefetch = 0 : i64, scratch_operands = 0 : i64, tpu.core_type = #tpu.core_type<tc>, window_params = [{transform_indices = @transform_0, window_bounds = array<i64: 8, 32>}, {transform_indices = @transform_1, window_bounds = array<i64: 8, 1>}, {transform_indices = @transform_2, window_bounds = array<i64: 1, 1, 1>}]} {
    %c0 = arith.constant 0 : index
    %c0_0 = arith.constant 0 : index
    %0 = vector.load %arg1[%c0, %c0_0] : memref<8x32xf32, #tpu.memory_space<vmem>>, vector<8x32xf32>
    %c0_1 = arith.constant 0 : index
    %c0_2 = arith.constant 0 : index
    %1 = vector.load %arg2[%c0_1, %c0_2] : memref<8x1xi32, #tpu.memory_space<vmem>>, vector<8x1xi32>
    %cst = arith.constant dense<0xFF800000> : vector<8xf32>
    %2 = vector.multi_reduction <maximumf>, %0, %cst [1] : vector<8x32xf32> to vector<8xf32>
    %3 = vector.shape_cast %2 : vector<8xf32> to vector<8x1xf32>
    %4 = vector.broadcast %3 : vector<8x1xf32> to vector<8x32xf32>
    %5 = arith.subf %0, %4 : vector<8x32xf32>
    %6 = math.exp %5 : vector<8x32xf32>
    %cst_3 = arith.constant dense<0.000000e+00> : vector<8xf32>
    %7 = vector.multi_reduction <add>, %6, %cst_3 [1] : vector<8x32xf32> to vector<8xf32>
    %8 = vector.shape_cast %7 : vector<8xf32> to vector<8x1xf32>
    %9 = tpu.reciprocal %8 : vector<8x1xf32> -> vector<8x1xf32>
    %10 = tpu.iota {dimensions = array<i32: 1>} : vector<8x32xi32>
    %11 = vector.broadcast %1 : vector<8x1xi32> to vector<8x32xi32>
    %12 = arith.cmpi eq, %10, %11 : vector<8x32xi32>
    %cst_4 = arith.constant 0.000000e+00 : f32
    %13 = vector.broadcast %cst_4 : f32 to vector<8x32xf32>
    %14 = arith.select %12, %0, %13 : vector<8x32xi1>, vector<8x32xf32>
    %cst_5 = arith.constant dense<0.000000e+00> : vector<8xf32>
    %15 = vector.multi_reduction <add>, %14, %cst_5 [1] : vector<8x32xf32> to vector<8xf32>
    %16 = vector.shape_cast %15 : vector<8xf32> to vector<8x1xf32>
    %17 = math.log %8 : vector<8x1xf32>
    %18 = arith.addf %3, %17 : vector<8x1xf32>
    %19 = arith.subf %18, %16 : vector<8x1xf32>
    %cst_6 = arith.constant 1.000000e-07 : f32
    %20 = vector.broadcast %cst_6 : f32 to vector<8x1xf32>
    %21 = arith.mulf %20, %8 : vector<8x1xf32>
    %22 = vector.broadcast %21 : vector<8x1xf32> to vector<8x32xf32>
    %23 = arith.maximumf %6, %22 : vector<8x32xf32>
    %cst_7 = arith.constant dense<0.000000e+00> : vector<8xf32>
    %24 = vector.multi_reduction <add>, %23, %cst_7 [1] : vector<8x32xf32> to vector<8xf32>
    %25 = vector.shape_cast %24 : vector<8xf32> to vector<8x1xf32>
    %26 = arith.mulf %9, %25 : vector<8x1xf32>
    %27 = arith.subf %16, %3 : vector<8x1xf32>
    %28 = math.exp %27 : vector<8x1xf32>
    %29 = arith.mulf %28, %9 : vector<8x1xf32>
    %cst_8 = arith.constant 1.000000e-07 : f32
    %30 = vector.broadcast %cst_8 : f32 to vector<8x1xf32>
    %31 = arith.maximumf %29, %30 : vector<8x1xf32>
    %32 = arith.subf %26, %31 : vector<8x1xf32>
    %cst_9 = arith.constant 9.21034049 : f32
    %33 = vector.broadcast %cst_9 : f32 to vector<8x1xf32>
    %34 = arith.mulf %33, %32 : vector<8x1xf32>
    %cst_10 = arith.constant 1.000000e+00 : f32
    %35 = vector.broadcast %cst_10 : f32 to vector<8x1xf32>
    %36 = arith.mulf %35, %19 : vector<8x1xf32>
    %cst_11 = arith.constant 1.000000e+00 : f32
    %37 = vector.broadcast %cst_11 : f32 to vector<8x1xf32>
    %38 = arith.mulf %37, %34 : vector<8x1xf32>
    %39 = arith.addf %36, %38 : vector<8x1xf32>
    %c8_i32 = arith.constant 8 : i32
    %40 = arith.muli %arg0, %c8_i32 : i32
    %41 = tpu.iota {dimensions = array<i32: 0>} : vector<8x1xi32>
    %42 = vector.broadcast %40 : i32 to vector<8x1xi32>
    %43 = arith.addi %42, %41 : vector<8x1xi32>
    %c16_i32 = arith.constant 16 : i32
    %44 = vector.broadcast %c16_i32 : i32 to vector<8x1xi32>
    %45 = arith.cmpi slt, %43, %44 : vector<8x1xi32>
    %cst_12 = arith.constant 0.000000e+00 : f32
    %46 = vector.broadcast %cst_12 : f32 to vector<8x1xf32>
    %47 = arith.select %45, %39, %46 : vector<8x1xi1>, vector<8x1xf32>
    %cst_13 = arith.constant dense<0.000000e+00> : vector<1xf32>
    %48 = vector.multi_reduction <add>, %47, %cst_13 [0] : vector<8x1xf32> to vector<1xf32>
    %49 = vector.shape_cast %48 : vector<1xf32> to vector<1x1xf32>
    %50 = vector.shape_cast %49 : vector<1x1xf32> to vector<1x1x1xf32>
    %c0_14 = arith.constant 0 : index
    %c0_15 = arith.constant 0 : index
    %c0_16 = arith.constant 0 : index
    %51 = vector.load %arg3[%c0_14, %c0_15, %c0_16] : memref<1x1x1xf32, #tpu.memory_space<vmem>>, vector<1x1x1xf32>
    tpu.vector_store %arg3[%c0_14, %c0_15, %c0_16], %50 {strides = array<i32>} : memref<1x1x1xf32, #tpu.memory_space<vmem>>, vector<1x1x1xf32>,
    return
  }
  func.func @transform_0(%arg0: i32) -> (i32, i32) {
    %c0_i32 = arith.constant 0 : i32
    %c0_i32_0 = arith.constant 0 : i32
    return %arg0, %c0_i32 : i32, i32
  }
  func.func @transform_1(%arg0: i32) -> (i32, i32) {
    %c0_i32 = arith.constant 0 : i32
    %c0_i32_0 = arith.constant 0 : i32
    return %arg0, %c0_i32 : i32, i32
  }
  func.func @transform_2(%arg0: i32) -> (i32, i32, i32) {
    %c0_i32 = arith.constant 0 : i32
    %c0_i32_0 = arith.constant 0 : i32
    %c0_i32_1 = arith.constant 0 : i32
    return %arg0, %c0_i32, %c0_i32_0 : i32, i32, i32
  }
}

</mosaic_0001>

<bundles_post_ra>
// kernel: tpu_custom_call.1
= control target key start
LH: loop header
LB: loop body
LE: loop exit
PB: predicated region body
PF: predicated region fallthrough
CT: control target
= control target key end

     0   :  { %s321_s9 = smov 0   ;;  %s354_s0 = inlined_call_operand.vmem [shape: f32[16,32], index: 0, kind: input, shape index: {}]   ;;  %s355_s1 = inlined_call_operand.vmem [shape: s32[16,1], index: 1, kind: input, shape index: {}]   ;;  %s356_s2 = inlined_call_operand.vmem [shape: f32[2,1,1], index: 2, kind: output, shape index: {}]  }
   0x1 LB: > { %s327_s10 = sadd.s32 4294967295, %s303_s9   ;;  %p273_p0 = scmp.ge.s32.totalorder %s303_s9, 1  ;;  %s303_s9 = sphi %s321_s9, %s12_s9  }
   0x2   : > { %p120_p1 = scmp.lt.s32.totalorder %s303_s9, 3 }
   0x4   : > { %p121_p2 = pnand %p273_p0, %p120_p1 }
   0x5   : > { %p143_p3 = scmp.lt.s32.totalorder (!%p121_p2), %s327_s10, 1  ;;  %v305_v0 = vmov (!%p121_p2), 0   ;;  %vm156_vm0 = vcmask (!%p121_p2), 261120   ;;  %v167_v7 = vlaneseq (!%p121_p2)  ;;  %s276_s19 = sshll.u32 (!%p121_p2), %s327_s10, 3  ;;  %vm208_vm3 = vcmask (!%p121_p2), 0  }
   0x6   : > { %124 = sbr.rel (%p121_p2) target bundleno = 488 (0x1e8), region = 28  ;;  %288 = vset.pattern.permute.xlu0 (!%p121_p2), %v305_v0  ;;  %v198_v27 = vstv (!%p121_p2), %s276_s19 }
   0x7   : > { %v168_v8 = vand.u32 (!%p121_p2), 127, %v167_v7  ;;  %v197_v26 = vshrl.u32 (!%p121_p2), %v167_v7, 7 }
   0x9   : > { %v199_v32 = vadd.s32 (!%p121_p2), %v198_v27, %v197_v26 }
   0xb   : > { %vm200_vm2 = vcmp.lt.s32.totalorder (!%p121_p2), %v199_v32, 16 }
   0xd   : > { %s333_s11 = scalar_select %p143_p3, %s327_s10, 1 }
   0xf   : > { %s274_s12 = sshll.u32 %s333_s11, 3  ;;  %s153_s22 = scalar_lea.vmem %s356_s2, %s333_s11 }
  0x10   : > { %s146_s15 = scalar_lea.vmem %s354_s0, %s274_s12  ;;  %s150_s18 = scalar_lea.vmem %s355_s1, %s274_s12 }
  0x11   : > { %v154_v1 = vld [vmem:[%s146_s15] sm:$0xff] }
  0x12   : > { %v157_v2 = vsel %vm156_vm0, %v154_v1, -inf  ;;  %v155_v3 = vld [vmem:[%s150_s18] sm:$0xff] }
  0x13   : > { %158 = vmax.xlane.f32.xlu0 %v157_v2 }
  0x29   : > { %170 = vperm.xlu0 %288, %v155_v3  }
  0xa0   : > { %v159_v4 = vpop.xlane.xlu0 %158 }
  0xa1   : > { %v160_v5 = vsub.f32 %v154_v1, %v159_v4 }
  0xa3   : > { %v161_v6 = vmul.f32 1.442695, %v160_v5 }
  0xa5   : > { %289 = vpow2.f32 %v161_v6 }
  0xa8   : > { %v171_v9 = vpop.permute.xlu0 %170 }
  0xa9   : > { %vm172_vm1 = vcmp.eq.s32.totalorder %v168_v8, %v171_v9 }
  0xaa   : > { %v173_v11 = vsel %vm172_vm1, %v154_v1, 0.0 }
  0xab   : > { %v174_v13 = vsel %vm156_vm0, %v173_v11, 0.0 }
  0xaf   : > { %v290_v10 = vpop.eup %289 }
  0xb0   : > { %v163_v12 = vsel %vm156_vm0, %v290_v10, 0.0 }
  0xb1   : > { %164 = vadd.xlane.f32.xlu1 %v163_v12 }
  0xb5   : > { %175 = vadd.xlane.f32.xlu1 %v174_v13 }
 0x13e   : > { %v165_v14 = vpop.xlane.xlu1 %164 }
 0x13f   : > { %v181_v15 = vmul.f32 1e-07, %v165_v14  ;;  %291 = vlog2.f32 %v165_v14 }
 0x141   : > { %v182_v16 = vmax.f32 %v290_v10, %v181_v15 }
 0x142   : > { %v176_v18 = vpop.xlane.xlu1 %175 }
 0x143   : > { %v183_v17 = vsel %vm156_vm0, %v182_v16, 0.0  ;;  %v187_v19 = vsub.f32 %v176_v18, %v159_v4 }
 0x144   : > { %184 = vadd.xlane.f32.xlu1 %v183_v17 }
 0x145   : > { %v188_v20 = vmul.f32 1.442695, %v187_v19 }
 0x147   : > { %293 = vpow2.f32 %v188_v20 }
 0x148   : > { %295 = vrcp.f32 %v165_v14 }
 0x149   : > { %v292_v21 = vpop.eup %291 }
 0x14a   : > { %v178_v24 = vmul.f32 0.6931472, %v292_v21 }
 0x14c   : > { %v179_v29 = vadd.f32 %v178_v24, %v159_v4 }
 0x14e   : > { %v180_v34 = vsub.f32 %v179_v29, %v176_v18 }
 0x151   : > { %v294_v22 = vpop.eup %293 }
 0x152   : > { %v296_v23 = vpop.eup %295 }
 0x153   : > { %v190_v25 = vmul.f32 %v296_v23, %v294_v22 }
 0x155   : > { %v191_v30 = vmax.f32 %v190_v25, 1e-07 }
 0x1d1   : > { %v185_v28 = vpop.xlane.xlu1 %184 }
 0x1d2   : > { %v186_v31 = vmul.f32 %v296_v23, %v185_v28 }
 0x1d4   : > { %v192_v33 = vsub.f32 %v186_v31, %v191_v30 }
 0x1d6   : > { %v193_v35 = vmul.f32 9.2103405, %v192_v33 }
 0x1d8   : > { %v194_v36 = vadd.f32 %v193_v35, %v180_v34 }
 0x1da   : > { %v201_v37 = vsel %vm200_vm2, %v194_v36, 0.0 }
 0x1db   : > { %v202_v38 = vrot.slane %v201_v37, 4 }
 0x1dd   : > { %v203_v39 = vadd.f32 %v202_v38, %v201_v37 }
 0x1df   : > { %v204_v40 = vrot.slane %v203_v39, 2 }
 0x1e1   : > { %v205_v41 = vadd.f32 %v204_v40, %v203_v39 }
 0x1e3   : > { %v206_v42 = vrot.slane %v205_v41, 1 }
 0x1e5   : > { %v207_v43 = vadd.f32 %v206_v42, %v205_v41 }
 0x1e7   : > { %209 = vst.msk [vmem:[%s153_s22] sm:$0x1] %vm208_vm3, %v207_v43 }
 0x1e8 PF: > { %s12_s9 = sadd.s32 1, %s303_s9  }
 0x1e9   : > { %p9_p4 = scmp.ge.s32.totalorder %s12_s9, 4  }
 0x1eb   :  { %11 = sbr.rel (!%p9_p4) target bundleno = 1 (0x1), region = 61 }

</bundles_post_ra>
